<compile_context>
chip_gen: v5e
topology: v5e:2x2
jax: 0.10.0
libtpu: 0.0.40
codegen_flags: <defaults>
</compile_context>

<pallas_src>
import functools

import jax
import jax.numpy as jnp
from jax.experimental import pallas as pl
from jax.experimental.pallas import tpu as pltpu

_MIB = 1024 * 1024


def _round_up(x, m):
    return ((x + m - 1) // m) * m


def _vmem_capacity_bytes():
    """Per-core VMEM capacity; conservative v7x default if the query fails."""
    try:
        return int(pltpu.get_tpu_info().vmem_capacity_bytes)
    except Exception:  # capability query only — never masks kernel errors
        return 64 * _MIB


# --------------------------------------------------------------------------- #
# Kernel
# --------------------------------------------------------------------------- #
def highway_kernel(x_ref, w_ref, b_ref, o_ref):
    """One batch tile; all highway layers fused in-kernel.

    x_ref : (bm, Dp)        input tile, compute dtype (bf16 by default)
    w_ref : (L, Dp, 2*Dp)   per-layer [gate | linear] weights (pre-transposed)
    b_ref : (L, 1, 2*Dp)    per-layer [gate | linear] biases, f32
    o_ref : (bm, Dp)        output tile
    """
    mxu_dtype = w_ref.dtype
    x = x_ref[...].astype(jnp.float32)           # carry the residual in f32
    dim = x.shape[-1]
    num_layers = w_ref.shape[0]
    biases = b_ref[...].astype(jnp.float32)      # hoisted: single VMEM load

    for i in range(num_layers):                  # small static L -> unrolled
        # One fused MXU matmul per layer: [gate_pre | lin_pre] = x @ [Wg|Wl] + b.
        # bf16 inputs, f32 accumulation.
        pre = jnp.dot(x.astype(mxu_dtype), w_ref[i],
                      preferred_element_type=jnp.float32) + biases[i]
        gate = jax.nn.sigmoid(pre[:, :dim])      # EUP exp + VPU
        nonlinear = jax.nn.relu(pre[:, dim:])    # VPU
        # x + g*(n - x) == g*n + (1-g)*x, one fewer VALU op per element.
        x = x + gate * (nonlinear - x)

    o_ref[...] = x.astype(o_ref.dtype)


# --------------------------------------------------------------------------- #
# One-time parameter packing (hoisted out of the per-call path)
# --------------------------------------------------------------------------- #
def pack_highway_params(wl, bl, wg, bg, *, compute_dtype=jnp.bfloat16):
    """Fuse [gate | linear] along the output axis and pad features to 128 lanes.

    wl, wg : (L, D, D)  linear / gate weights, pre-transposed (x @ W + b)
    bl, bg : (L, 1, D)  linear / gate biases
    Returns (w_fused, b_fused) with shapes (L, Dp, 2*Dp) and (L, 1, 2*Dp).

    Padded lanes stay exactly zero through every layer: zero weight cols/rows,
    zero bias -> gate 0.5, relu(0) = 0, and x_pad + 0.5*(0 - x_pad) = 0
    since x_pad starts at 0.
    """
    L, D, _ = wl.shape
    dp = _round_up(max(D, 128), 128)
    pad_d = dp - D

    def pad_w(w):
        return jnp.pad(w.astype(jnp.float32), ((0, 0), (0, pad_d), (0, pad_d)))

    def pad_b(b):
        return jnp.pad(b.astype(jnp.float32), ((0, 0), (0, 0), (0, pad_d)))

    w_fused = jnp.concatenate([pad_w(wg), pad_w(wl)], axis=-1).astype(compute_dtype)
    b_fused = jnp.concatenate([pad_b(bg), pad_b(bl)], axis=-1)   # keep biases f32
    return w_fused, b_fused


# --------------------------------------------------------------------------- #
# Forward pass
# --------------------------------------------------------------------------- #
@functools.partial(jax.jit, static_argnames=("block_batch",))
def highway_forward(x, w_fused, b_fused, *, block_batch=512):
    """Forward pass matching HighwayNetwork.forward.

    x       : (B, D)         input
    w_fused : (L, Dp, 2*Dp)  from pack_highway_params (compute dtype)
    b_fused : (L, 1, 2*Dp)   from pack_highway_params (f32)
    """
    B, D = x.shape
    L, dp, two_dp = w_fused.shape
    compute_dtype = w_fused.dtype

    w_itemsize = jnp.dtype(w_fused.dtype).itemsize
    x_itemsize = jnp.dtype(compute_dtype).itemsize
    o_itemsize = jnp.dtype(x.dtype).itemsize
    w_bytes = L * dp * two_dp * w_itemsize
    b_bytes = L * two_dp * 4

    # ---- batch tile: >=2 grid steps (v7x megacore), 8-sublane aligned -------
    bm = min(_round_up(block_batch, 8), _round_up((B + 1) // 2, 8))
    if dp >= 1024:                      # unrolled-layer intermediates get large
        bm = min(bm, 128)
    bm = max(bm, 8)

    # ---- generation-aware VMEM budget; shrink bm until the footprint fits ---
    vmem_cap = _vmem_capacity_bytes()
    budget = (vmem_cap * 3) // 4        # headroom for Mosaic internal scratch

    # Single-buffer the grid-invariant weight/bias blocks only when double
    # buffering them would actually pressure the budget.
    single_buffer_weights = 2 * (w_bytes + b_bytes) > budget // 3
    w_bufs = 1 if single_buffer_weights else 2

    def footprint(bm_):
        return (w_bufs * (w_bytes + b_bytes)        # resident weights/biases
                + 2 * bm_ * dp * x_itemsize         # double-buffered x tiles
                + 2 * bm_ * dp * o_itemsize         # double-buffered out tiles
                + 3 * bm_ * two_dp * 4)             # live f32 intermediates

    while footprint(bm) > budget and bm > 8:
        bm = max(8, _round_up(bm // 2, 8))
    # TODO(synk): if the weight stack alone exceeds the budget (huge L*D^2 on
    # v7x), stream per-layer (Dp, 2*Dp) slabs via memory_space=pl.ANY +
    # pltpu.emit_pipeline instead of keeping the whole stack resident.

    vmem_limit = int(min(max(footprint(bm) + 2 * _MIB, 32 * _MIB), budget))

    b_pad = _round_up(B, bm)
    grid = (b_pad // bm,)

    # ---- pad / cast the activation tile (fused under jit) -------------------
    x_p = x.astype(compute_dtype)
    if (dp - D) or (b_pad - B):
        x_p = jnp.pad(x_p, ((0, b_pad - B), (0, dp - D)))

    # ---- specs ---------------------------------------------------------------
    x_spec = pl.BlockSpec((bm, dp), lambda i: (i, 0))
    o_spec = pl.BlockSpec((bm, dp), lambda i: (i, 0))
    if single_buffer_weights:
        w_spec = pl.BlockSpec((L, dp, two_dp), lambda i: (0, 0, 0),
                              pipeline_mode=pl.Buffered(1))
        b_spec = pl.BlockSpec((L, 1, two_dp), lambda i: (0, 0, 0),
                              pipeline_mode=pl.Buffered(1))
    else:
        w_spec = pl.BlockSpec((L, dp, two_dp), lambda i: (0, 0, 0))
        b_spec = pl.BlockSpec((L, 1, two_dp), lambda i: (0, 0, 0))

    out = pl.pallas_call(
        highway_kernel,
        out_shape=jax.ShapeDtypeStruct((b_pad, dp), x.dtype),
        grid_spec=pltpu.PrefetchScalarGridSpec(
            num_scalar_prefetch=0,
            grid=grid,
            in_specs=[x_spec, w_spec, b_spec],
            out_specs=o_spec,
        ),
        compiler_params=pltpu.CompilerParams(
            dimension_semantics=("parallel",),
            vmem_limit_bytes=vmem_limit,
        ),
    )(x_p, w_fused, b_fused)

    return out[:B, :D]


# --------------------------------------------------------------------------- #
# Reference + init
# --------------------------------------------------------------------------- #
def highway_reference(x, wl, bl, wg, bg):
    """Pure-JAX reference matching the PyTorch forward exactly."""
    x = x.astype(jnp.float32)
    for i in range(wl.shape[0]):
        gate = jax.nn.sigmoid(x @ wg[i] + bg[i, 0])
        nonlinear = jax.nn.relu(x @ wl[i] + bl[i, 0])
        x = gate * nonlinear + (1.0 - gate) * x
    return x


def init_params(key, layer_num, dim):
    """Deterministic PyTorch-style uniform(-1/sqrt(dim), 1/sqrt(dim)) init."""
    bound = 1.0 / jnp.sqrt(jnp.float32(dim))
    ks = jax.random.split(key, 4)
    wl = jax.random.uniform(ks[0], (layer_num, dim, dim), jnp.float32, -bound, bound)
    bl = jax.random.uniform(ks[1], (layer_num, 1, dim), jnp.float32, -bound, bound)
    wg = jax.random.uniform(ks[2], (layer_num, dim, dim), jnp.float32, -bound, bound)
    bg = jax.random.uniform(ks[3], (layer_num, 1, dim), jnp.float32, -bound, bound)
    return wl, bl, wg, bg


if __name__ == "__main__":
    layer_num = 3
    dim = 32
    batch = 16

    key = jax.random.PRNGKey(0)
    k_x, k_x2, k_p = jax.random.split(key, 3)
    x = jax.random.normal(k_x, (batch, dim), jnp.float32)
    wl, bl, wg, bg = init_params(k_p, layer_num, dim)
    ref = highway_reference(x, wl, bl, wg, bg)

    # f32 MXU path: tight tolerance against the f32 reference.
    w_f32, b_f32 = pack_highway_params(wl, bl, wg, bg, compute_dtype=jnp.float32)
    out_f32 = jax.block_until_ready(highway_forward(x, w_f32, b_f32, block_batch=256))
    assert out_f32.shape == (batch, dim)
    assert jnp.allclose(out_f32, ref, atol=1e-5, rtol=1e-5), "mismatch (f32 path)"

    # bf16 MXU path (production default): native MXU rate, f32 accumulation.
    w_bf16, b_bf16 = pack_highway_params(wl, bl, wg, bg)   # bf16 weights
    out_bf16 = jax.block_until_ready(highway_forward(x, w_bf16, b_bf16, block_batch=256))
    assert out_bf16.shape == (batch, dim)
    assert jnp.allclose(out_bf16, ref, atol=3e-2, rtol=3e-2), "mismatch (bf16 path)"

    # Ragged batch: exercises the zero-padded remainder tile and a >1-step grid.
    x2 = jax.random.normal(k_x2, (13, dim), jnp.float32)
    out2 = jax.block_until_ready(highway_forward(x2, w_f32, b_f32, block_batch=8))
    ref2 = highway_reference(x2, wl, bl, wg, bg)
    assert out2.shape == (13, dim)
    assert jnp.allclose(out2, ref2, atol=1e-5, rtol=1e-5), "mismatch (ragged batch)"

    print("KERNEL_OK")
</pallas_src>

<mosaic_0001>
module attributes {stable_mosaic.version = 11 : i64} {
  func.func @highway_kernel(%arg0: i32, %arg1: memref<8x128xf32, #tpu.memory_space<vmem>>, %arg2: memref<3x128x256xf32, #tpu.memory_space<vmem>>, %arg3: memref<3x1x256xf32, #tpu.memory_space<vmem>>, %arg4: memref<8x128xf32, #tpu.memory_space<vmem>>) attributes {dimension_semantics = [#tpu.dimension_semantics<parallel>], iteration_bounds = array<i64: 2>, scalar_prefetch = 0 : i64, scratch_operands = 0 : i64, tpu.core_type = #tpu.core_type<tc>, window_params = [{transform_indices = @transform_0, window_bounds = array<i64: 8, 128>}, {pipeline_mode = #tpu.pipeline_mode<synchronous>, transform_indices = @transform_1, window_bounds = array<i64: 3, 128, 256>}, {pipeline_mode = #tpu.pipeline_mode<synchronous>, transform_indices = @transform_2, window_bounds = array<i64: 3, 1, 256>}, {transform_indices = @transform_3, window_bounds = array<i64: 8, 128>}]} {
    %c0 = arith.constant 0 : index
    %c0_0 = arith.constant 0 : index
    %0 = vector.load %arg1[%c0, %c0_0] : memref<8x128xf32, #tpu.memory_space<vmem>>, vector<8x128xf32>
    %c0_1 = arith.constant 0 : index
    %c0_2 = arith.constant 0 : index
    %c0_3 = arith.constant 0 : index
    %1 = vector.load %arg3[%c0_1, %c0_2, %c0_3] : memref<3x1x256xf32, #tpu.memory_space<vmem>>, vector<3x1x256xf32>
    %c0_4 = arith.constant 0 : index
    %c0_5 = arith.constant 0 : index
    %c0_6 = arith.constant 0 : index
    %2 = vector.load %arg2[%c0_4, %c0_5, %c0_6] : memref<3x128x256xf32, #tpu.memory_space<vmem>>, vector<1x128x256xf32>
    %3 = vector.shape_cast %2 : vector<1x128x256xf32> to vector<128x256xf32>
    %cst = arith.constant dense<0.000000e+00> : vector<8x256xf32>
    %4 = tpu.matmul %0, %3, %cst {dimension_numbers = #tpu.dot_dimension_numbers<[1], [0], [0], [1], [0, 0, 1, 1], [], []>} : vector<8x128xf32>, vector<128x256xf32>, vector<8x256xf32> -> vector<8x256xf32>
    %5 = vector.extract_strided_slice %1 {offsets = [0, 0, 0], sizes = [1, 1, 256], strides = [1, 1, 1]} : vector<3x1x256xf32> to vector<1x1x256xf32>
    %6 = vector.shape_cast %5 : vector<1x1x256xf32> to vector<1x256xf32>
    %7 = vector.broadcast %6 : vector<1x256xf32> to vector<8x256xf32>
    %8 = arith.addf %4, %7 : vector<8x256xf32>
    %9 = vector.extract_strided_slice %8 {offsets = [0, 0], sizes = [8, 128], strides = [1, 1]} : vector<8x256xf32> to vector<8x128xf32>
    %10 = arith.negf %9 : vector<8x128xf32>
    %11 = math.exp %10 : vector<8x128xf32>
    %cst_7 = arith.constant 1.000000e+00 : f32
    %12 = vector.broadcast %cst_7 : f32 to vector<8x128xf32>
    %13 = arith.addf %12, %11 : vector<8x128xf32>
    %14 = arith.divf %12, %13 : vector<8x128xf32>
    %15 = vector.extract_strided_slice %8 {offsets = [0, 128], sizes = [8, 128], strides = [1, 1]} : vector<8x256xf32> to vector<8x128xf32>
    %cst_8 = arith.constant 0.000000e+00 : f32
    %16 = vector.broadcast %cst_8 : f32 to vector<8x128xf32>
    %17 = arith.maximumf %15, %16 : vector<8x128xf32>
    %18 = arith.subf %17, %0 : vector<8x128xf32>
    %19 = arith.mulf %14, %18 : vector<8x128xf32>
    %20 = arith.addf %0, %19 : vector<8x128xf32>
    %c1 = arith.constant 1 : index
    %c0_9 = arith.constant 0 : index
    %c0_10 = arith.constant 0 : index
    %21 = vector.load %arg2[%c1, %c0_9, %c0_10] : memref<3x128x256xf32, #tpu.memory_space<vmem>>, vector<1x128x256xf32>
    %22 = vector.shape_cast %21 : vector<1x128x256xf32> to vector<128x256xf32>
    %cst_11 = arith.constant dense<0.000000e+00> : vector<8x256xf32>
    %23 = tpu.matmul %20, %22, %cst_11 {dimension_numbers = #tpu.dot_dimension_numbers<[1], [0], [0], [1], [0, 0, 1, 1], [], []>} : vector<8x128xf32>, vector<128x256xf32>, vector<8x256xf32> -> vector<8x256xf32>
    %24 = vector.extract_strided_slice %1 {offsets = [1, 0, 0], sizes = [1, 1, 256], strides = [1, 1, 1]} : vector<3x1x256xf32> to vector<1x1x256xf32>
    %25 = vector.shape_cast %24 : vector<1x1x256xf32> to vector<1x256xf32>
    %26 = vector.broadcast %25 : vector<1x256xf32> to vector<8x256xf32>
    %27 = arith.addf %23, %26 : vector<8x256xf32>
    %28 = vector.extract_strided_slice %27 {offsets = [0, 0], sizes = [8, 128], strides = [1, 1]} : vector<8x256xf32> to vector<8x128xf32>
    %29 = arith.negf %28 : vector<8x128xf32>
    %30 = math.exp %29 : vector<8x128xf32>
    %cst_12 = arith.constant 1.000000e+00 : f32
    %31 = vector.broadcast %cst_12 : f32 to vector<8x128xf32>
    %32 = arith.addf %31, %30 : vector<8x128xf32>
    %33 = arith.divf %31, %32 : vector<8x128xf32>
    %34 = vector.extract_strided_slice %27 {offsets = [0, 128], sizes = [8, 128], strides = [1, 1]} : vector<8x256xf32> to vector<8x128xf32>
    %cst_13 = arith.constant 0.000000e+00 : f32
    %35 = vector.broadcast %cst_13 : f32 to vector<8x128xf32>
    %36 = arith.maximumf %34, %35 : vector<8x128xf32>
    %37 = arith.subf %36, %20 : vector<8x128xf32>
    %38 = arith.mulf %33, %37 : vector<8x128xf32>
    %39 = arith.addf %20, %38 : vector<8x128xf32>
    %c2 = arith.constant 2 : index
    %c0_14 = arith.constant 0 : index
    %c0_15 = arith.constant 0 : index
    %40 = vector.load %arg2[%c2, %c0_14, %c0_15] : memref<3x128x256xf32, #tpu.memory_space<vmem>>, vector<1x128x256xf32>
    %41 = vector.shape_cast %40 : vector<1x128x256xf32> to vector<128x256xf32>
    %cst_16 = arith.constant dense<0.000000e+00> : vector<8x256xf32>
    %42 = tpu.matmul %39, %41, %cst_16 {dimension_numbers = #tpu.dot_dimension_numbers<[1], [0], [0], [1], [0, 0, 1, 1], [], []>} : vector<8x128xf32>, vector<128x256xf32>, vector<8x256xf32> -> vector<8x256xf32>
    %43 = vector.extract_strided_slice %1 {offsets = [2, 0, 0], sizes = [1, 1, 256], strides = [1, 1, 1]} : vector<3x1x256xf32> to vector<1x1x256xf32>
    %44 = vector.shape_cast %43 : vector<1x1x256xf32> to vector<1x256xf32>
    %45 = vector.broadcast %44 : vector<1x256xf32> to vector<8x256xf32>
    %46 = arith.addf %42, %45 : vector<8x256xf32>
    %47 = vector.extract_strided_slice %46 {offsets = [0, 0], sizes = [8, 128], strides = [1, 1]} : vector<8x256xf32> to vector<8x128xf32>
    %48 = arith.negf %47 : vector<8x128xf32>
    %49 = math.exp %48 : vector<8x128xf32>
    %cst_17 = arith.constant 1.000000e+00 : f32
    %50 = vector.broadcast %cst_17 : f32 to vector<8x128xf32>
    %51 = arith.addf %50, %49 : vector<8x128xf32>
    %52 = arith.divf %50, %51 : vector<8x128xf32>
    %53 = vector.extract_strided_slice %46 {offsets = [0, 128], sizes = [8, 128], strides = [1, 1]} : vector<8x256xf32> to vector<8x128xf32>
    %cst_18 = arith.constant 0.000000e+00 : f32
    %54 = vector.broadcast %cst_18 : f32 to vector<8x128xf32>
    %55 = arith.maximumf %53, %54 : vector<8x128xf32>
    %56 = arith.subf %55, %39 : vector<8x128xf32>
    %57 = arith.mulf %52, %56 : vector<8x128xf32>
    %58 = arith.addf %39, %57 : vector<8x128xf32>
    %c0_19 = arith.constant 0 : index
    %c0_20 = arith.constant 0 : index
    %59 = vector.load %arg4[%c0_19, %c0_20] : memref<8x128xf32, #tpu.memory_space<vmem>>, vector<8x128xf32>
    tpu.vector_store %arg4[%c0_19, %c0_20], %58 {strides = array<i32>} : memref<8x128xf32, #tpu.memory_space<vmem>>, vector<8x128xf32>,
    return
  }
  func.func @transform_0(%arg0: i32) -> (i32, i32) {
    %c0_i32 = arith.constant 0 : i32
    %c0_i32_0 = arith.constant 0 : i32
    return %arg0, %c0_i32 : i32, i32
  }
  func.func @transform_1(%arg0: i32) -> (i32, i32, i32) {
    %c0_i32 = arith.constant 0 : i32
    %c0_i32_0 = arith.constant 0 : i32
    %c0_i32_1 = arith.constant 0 : i32
    %c0_i32_2 = arith.constant 0 : i32
    return %c0_i32, %c0_i32_0, %c0_i32_1 : i32, i32, i32
  }
  func.func @transform_2(%arg0: i32) -> (i32, i32, i32) {
    %c0_i32 = arith.constant 0 : i32
    %c0_i32_0 = arith.constant 0 : i32
    %c0_i32_1 = arith.constant 0 : i32
    %c0_i32_2 = arith.constant 0 : i32
    return %c0_i32, %c0_i32_0, %c0_i32_1 : i32, i32, i32
  }
  func.func @transform_3(%arg0: i32) -> (i32, i32) {
    %c0_i32 = arith.constant 0 : i32
    %c0_i32_0 = arith.constant 0 : i32
    return %arg0, %c0_i32 : i32, i32
  }
}

</mosaic_0001>

<bundles_post_ra>
// kernel: highway_forward.1
= control target key start
LH: loop header
LB: loop body
LE: loop exit
PB: predicated region body
PF: predicated region fallthrough
CT: control target
= control target key end

     0   :  { %8 = vsyncpa [#allocation3], 0  ;;  %s893_s0 = inlined_call_operand.vmem [shape: f32[16,128], index: 0, kind: input, shape index: {}]   ;;  %s894_s1 = inlined_call_operand.hbm [shape: f32[3,128,256], index: 1, kind: input, shape index: {}]   ;;  %s895_s2 = inlined_call_operand.vmem [shape: f32[3,1,256], index: 2, kind: input, shape index: {}]   ;;  %s896_s3 = inlined_call_operand.hbm [shape: f32[16,128], index: 3, kind: output, shape index: {}]  }
   0x1   :  { %9 = vsyncpa [#allocation4], 0 }
   0x2   :  { %11 = vsyncpa [#allocation4 + $0x1], 0  ;;  %s777_s12 = smov 0   ;;  %s779_s13 = smov 0  }
   0x3   :  { %s781_s14 = smov 0   ;;  %s783_s15 = smov 0  }
   0x4 LB: > { %s798_s16 = sadd.s32 4294967295, %s752_s15   ;;  %s577_s17 = sadd.s32 4294967294, %s752_s15   ;;  %s752_s15 = sphi %s783_s15, %s902_s15   ;;  %s748_s14 = sphi %s781_s14, %s901_s14   ;;  %s744_s13 = sphi %s779_s13, %s900_s13   ;;  %s740_s12 = sphi %s777_s12, %s899_s12  }
   0x5   : > { %s802_s18 = sadd.s32 1, %s752_s15   ;;  %s92_s19 = sadd.s32 1, %s748_s14 }
   0x6   : > { %s89_s20 = ssub.s32 %s752_s15, %s802_s18  ;;  %p102_p0 = scmp.ne.s32.totalorder %s748_s14, %s744_s13 }
   0x7   : > { %p90_p1 = scmp.eq.s32.totalorder %s89_s20, 0  ;;  %p103_p2 = scmp.eq.s32.totalorder %s798_s16, 1 }
   0x8   : > { %p108_p3 = scmp.ne.s32.totalorder %s744_s13, %s740_s12  ;;  %p109_p4 = scmp.eq.s32.totalorder %s577_s17, 1 }
   0x9   : > { %s813_s21 = scalar_select %p90_p1, %s748_s14, %s92_s19  }
   0xa   : > { %p815_p5 = por %p103_p2, %p102_p0  ;;  %p819_p6 = por %p109_p4, %p108_p3 }
   0xb   : > { %p578_p7 = scmp.ge.s32.totalorder %s752_s15, 1  ;;  %p116_p8 = scmp.lt.s32.totalorder %s752_s15, 3 }
   0xc   : > { %p606_p9 = scmp.eq.s32.totalorder %s798_s16, 0  ;;  %s127_s26 = sshll.u32 %s894_s1, 4  ;;  %s128_s26 = int_to_ptr.hbm [resolvable:$true] %s127_s26 }
   0xd   : > { %p117_p10 = pnand %p578_p7, %p116_p8  ;;  %s754_s27 = smov [#allocation2]  }
   0xe   : > { %s129_s28 = sshll.u32 %s754_s27, 4  ;;  %s755_s29 = smov 256   ;;  %s130_s28 = int_to_ptr.vmem [resolvable:$true] %s129_s28 }
   0xf   : > { %p598_p11 = pneg %p117_p10  ;;  %s756_s30 = smov 16  }
  0x10   : > { %155 = sbr.rel (%p117_p10) target bundleno = 543 (0x21f), region = 32 }
  0x11   : > { %p599_p12 = pnand %p606_p9, %p598_p11 }
  0x13   : > { %601 = dma.hbm_to_vmem [thread:$0]  (!%p599_p12), %s128_s26, 12288, %s130_s28, [#allocation3], %s755_s29, %s755_s29, %s756_s30  }
  0x15   : > { %731 = dma.done.wait (%p606_p9), [#allocation3], 12288  }
  0x16   : > { %733 = vsyncadd (%p606_p9), [#allocation3], 4294955008  ;;  %v217_v0 = vld [vmem:[#allocation2 + $0xf0] sm:$0xff]  ;;  %v215_v1 = vld [vmem:[#allocation2 + $0xe0] sm:$0xff]  ;;  %p179_p13 = scmp.lt.s32.totalorder %s798_s16, 1  ;;  %s176_s24 = sand.u32 1, %s744_s13  }
  0x17   : > { %224 = vmatpush.msra.mxu0 %v217_v0  ;;  %v213_v2 = vld [vmem:[#allocation2 + $0xd0] sm:$0xff]  ;;  %v211_v3 = vld [vmem:[#allocation2 + $0xc0] sm:$0xff]  ;;  %v218_v4 = vld [vmem:[#allocation2 + $0xf8] sm:$0xff]  ;;  %s583_s25 = sshll.u32 %s176_s24, 3  ;;  %s589_s26 = sshll.u32 %s798_s16, 3 }
  0x18   : > { %244 = vmatpush.msra.mxu1 %v218_v4  ;;  %v216_v5 = vld [vmem:[#allocation2 + $0xe8] sm:$0xff]  ;;  %v209_v6 = vld [vmem:[#allocation2 + $0xb0] sm:$0xff]  ;;  %v214_v7 = vld [vmem:[#allocation2 + $0xd8] sm:$0xff]  ;;  %s180_s4 = scalar_select %p179_p13, %s798_s16, 1 }
  0x19   : > { %225 = vmatpush.msra.mxu0 %v215_v1  ;;  %v207_v8 = vld [vmem:[#allocation2 + $0xa0] sm:$0xff]  ;;  %v212_v9 = vld [vmem:[#allocation2 + $0xc8] sm:$0xff]  ;;  %v205_v10 = vld [vmem:[#allocation2 + $0x90] sm:$0xff]  ;;  %s501_s29 = scalar_lea.hbm %s896_s3, %s589_s26  ;;  %s178_s30 = scalar_lea.vmem [#allocation5], %s583_s25 }
  0x1a   : > { %245 = vmatpush.msra.mxu1 %v216_v5  ;;  %v210_v11 = vld [vmem:[#allocation2 + $0xb8] sm:$0xff]  ;;  %v203_v12 = vld [vmem:[#allocation2 + $0x80] sm:$0xff]  ;;  %v208_v13 = vld [vmem:[#allocation2 + $0xa8] sm:$0xff]  ;;  %s584_s5 = sshll.u32 %s180_s4, 3  ;;  %s503_s4 = sshll.u32 %s178_s30, 4  ;;  %s504_s4 = int_to_ptr.vmem [resolvable:$true] %s503_s4 }
  0x1b   : > { %226 = vmatpush.msra.mxu0 %v213_v2  ;;  %v201_v14 = vld [vmem:[#allocation2 + $0x70] sm:$0xff]  ;;  %v206_v15 = vld [vmem:[#allocation2 + $0x98] sm:$0xff]  ;;  %v199_v16 = vld [vmem:[#allocation2 + $0x60] sm:$0xff]  ;;  %s182_s8 = scalar_lea.vmem %s893_s0, %s584_s5  ;;  %s505_s16 = sshll.u32 %s501_s29, 4  ;;  %s506_s16 = int_to_ptr.hbm [resolvable:$true] %s505_s16 }
  0x1c   : > { %246 = vmatpush.msra.mxu1 %v214_v7  ;;  %v204_v17 = vld [vmem:[#allocation2 + $0x88] sm:$0xff]  ;;  %v197_v18 = vld [vmem:[#allocation2 + $0x50] sm:$0xff]  ;;  %v202_v19 = vld [vmem:[#allocation2 + $0x78] sm:$0xff]  ;;  %s491_s5 = scalar_lea.sflag [#allocation4], %s176_s24  ;;  %s700_s6 = sshra.s32 %s506_s16, 4  ;;  %s701_s6 = int_to_ptr.hbm [resolvable:$true] %s700_s6 }
  0x1d   : > { %227 = vmatpush.msra.mxu0 %v211_v3  ;;  %v195_v20 = vld [vmem:[#allocation2 + $0x40] sm:$0xff]  ;;  %v200_v21 = vld [vmem:[#allocation2 + $0x68] sm:$0xff]  ;;  %v193_v22 = vld [vmem:[#allocation2 + $0x30] sm:$0xff]  ;;  %s702_s7 = scalar_lea.hbm %s701_s6, 8  ;;  %s706_s10 = scalar_lea.hbm %s896_s3, 16 }
  0x1e   : > { %247 = vmatpush.msra.mxu1 %v212_v9  ;;  %v198_v23 = vld [vmem:[#allocation2 + $0x58] sm:$0xff]  ;;  %v191_v24 = vld [vmem:[#allocation2 + $0x20] sm:$0xff]  ;;  %v196_v25 = vld [vmem:[#allocation2 + $0x48] sm:$0xff]  ;;  %p703_p0 = scmp.ne.s32.totalorder %s701_s6, %s702_s7  ;;  %p707_p3 = scmp.lt.s32.totalorder %s701_s6, %s896_s3 }
  0x1f   : > { %228 = vmatpush.msra.mxu0 %v209_v6  ;;  %v189_v26 = vld [vmem:[#allocation2 + $0x10] sm:$0xff]  ;;  %v194_v27 = vld [vmem:[#allocation2 + $0x38] sm:$0xff]  ;;  %v187_v28 = vld [vmem:[#allocation2] sm:$0xff]  ;;  %p708_p4 = scmp.lt.s32.totalorder %s706_s10, %s702_s7 }
  0x20   : > { %248 = vmatpush.msra.mxu1 %v210_v11  ;;  %v192_v29 = vld [vmem:[#allocation2 + $0x28] sm:$0xff]  ;;  %v840_v30 = vld [vmem:[%s182_s8] sm:$0xff]  ;;  %v190_v31 = vld [vmem:[#allocation2 + $0x18] sm:$0xff]  ;;  %p704_p1 = pnand %p703_p0, %p815_p5 }
  0x21   : > { %229 = vmatpush.msra.mxu0 %v207_v8  ;;  %v188_v32 = vld [vmem:[#allocation2 + $0x8] sm:$0xff]  ;;  %v318_v33 = vld [vmem:[#allocation2 + $0x1f0] sm:$0xff]  ;;  %v319_v34 = vld [vmem:[#allocation2 + $0x1f8] sm:$0xff]  ;;  %p709_p7 = por %p708_p4, %p707_p3 }
  0x22   : > { %249 = vmatpush.msra.mxu1 %v208_v13  ;;  %325 = vmatpush.msra.mxu2 %v318_v33  ;;  %v316_v35 = vld [vmem:[#allocation2 + $0x1e0] sm:$0xff]  ;;  %v317_v36 = vld [vmem:[#allocation2 + $0x1e8] sm:$0xff]  ;;  %v314_v37 = vld [vmem:[#allocation2 + $0x1d0] sm:$0xff]  ;;  %p705_p2 = pneg %p704_p1 }
  0x23   : > { %230 = vmatpush.msra.mxu0 %v205_v10  ;;  %345 = vmatpush.msra.mxu3 %v319_v34  ;;  %v315_v38 = vld [vmem:[#allocation2 + $0x1d8] sm:$0xff]  ;;  %v312_v39 = vld [vmem:[#allocation2 + $0x1c0] sm:$0xff]  ;;  %v313_v40 = vld [vmem:[#allocation2 + $0x1c8] sm:$0xff] }
  0x24   : > { %250 = vmatpush.msra.mxu1 %v206_v15  ;;  %326 = vmatpush.msra.mxu2 %v316_v35  ;;  %v310_v41 = vld [vmem:[#allocation2 + $0x1b0] sm:$0xff]  ;;  %v311_v42 = vld [vmem:[#allocation2 + $0x1b8] sm:$0xff]  ;;  %v308_v43 = vld [vmem:[#allocation2 + $0x1a0] sm:$0xff]  ;;  %p710_p8 = pnand %p709_p7, %p705_p2 }
  0x25   : > { %231 = vmatpush.msra.mxu0 %v203_v12  ;;  %346 = vmatpush.msra.mxu3 %v317_v36  ;;  %v309_v44 = vld [vmem:[#allocation2 + $0x1a8] sm:$0xff]  ;;  %v306_v45 = vld [vmem:[#allocation2 + $0x190] sm:$0xff]  ;;  %v307_v46 = vld [vmem:[#allocation2 + $0x198] sm:$0xff] }
  0x26   : > { %251 = vmatpush.msra.mxu1 %v204_v17  ;;  %327 = vmatpush.msra.mxu2 %v314_v37  ;;  %v304_v47 = vld [vmem:[#allocation2 + $0x180] sm:$0xff]  ;;  %v305_v48 = vld [vmem:[#allocation2 + $0x188] sm:$0xff]  ;;  %v302_v49 = vld [vmem:[#allocation2 + $0x170] sm:$0xff] }
  0x27   : > { %232 = vmatpush.msra.mxu0 %v201_v14  ;;  %347 = vmatpush.msra.mxu3 %v315_v38  ;;  %v303_v50 = vld [vmem:[#allocation2 + $0x178] sm:$0xff]  ;;  %v300_v51 = vld [vmem:[#allocation2 + $0x160] sm:$0xff]  ;;  %v301_v52 = vld [vmem:[#allocation2 + $0x168] sm:$0xff] }
  0x28   : > { %252 = vmatpush.msra.mxu1 %v202_v19  ;;  %328 = vmatpush.msra.mxu2 %v312_v39  ;;  %v298_v53 = vld [vmem:[#allocation2 + $0x150] sm:$0xff]  ;;  %v299_v54 = vld [vmem:[#allocation2 + $0x158] sm:$0xff]  ;;  %v296_v55 = vld [vmem:[#allocation2 + $0x140] sm:$0xff] }
  0x29   : > { %233 = vmatpush.msra.mxu0 %v199_v16  ;;  %348 = vmatpush.msra.mxu3 %v313_v40  ;;  %v297_v56 = vld [vmem:[#allocation2 + $0x148] sm:$0xff]  ;;  %v184_v57 = vld [vmem:[%s895_s2] sm:$0x3]  ;;  %v294_v58 = vld [vmem:[#allocation2 + $0x130] sm:$0xff] }
  0x2a   : > { %253 = vmatpush.msra.mxu1 %v200_v21  ;;  %329 = vmatpush.msra.mxu2 %v310_v41  ;;  %v295_v59 = vld [vmem:[#allocation2 + $0x138] sm:$0xff]  ;;  %v220_v60 = vperm.slane %v184_v57, 0  ;;  %v292_v61 = vld [vmem:[#allocation2 + $0x120] sm:$0xff]  ;;  %v293_v62 = vld [vmem:[#allocation2 + $0x128] sm:$0xff]  ;;  %v221_v8 = vperm.slane %v184_v57, 1 }
  0x2b   : > { %234 = vmatpush.msra.mxu0 %v197_v18  ;;  %349 = vmatpush.msra.mxu3 %v311_v42  ;;  %v290_v63 = vld [vmem:[#allocation2 + $0x110] sm:$0xff]  ;;  %v291_v0 = vld [vmem:[#allocation2 + $0x118] sm:$0xff]  ;;  %v288_v3 = vld [vmem:[#allocation2 + $0x100] sm:$0xff] }
  0x2c   : > { %254 = vmatpush.msra.mxu1 %v198_v23  ;;  %330 = vmatpush.msra.mxu2 %v308_v43  ;;  %v289_v4 = vld [vmem:[#allocation2 + $0x108] sm:$0xff]  ;;  %v412_v34 = vld [vmem:[#allocation2 + $0x2b8] sm:$0xff]  ;;  %v409_v35 = vld [vmem:[#allocation2 + $0x2a0] sm:$0xff] }
  0x2d   : > { %235 = vmatpush.msra.mxu0 %v195_v20  ;;  %350 = vmatpush.msra.mxu3 %v309_v44  ;;  %v414_v33 = vld [vmem:[#allocation2 + $0x2c8] sm:$0xff]  ;;  %v407_v37 = vld [vmem:[#allocation2 + $0x290] sm:$0xff]  ;;  %v408_v38 = vld [vmem:[#allocation2 + $0x298] sm:$0xff] }
  0x2e   : > { %255 = vmatpush.msra.mxu1 %v196_v25  ;;  %331 = vmatpush.msra.mxu2 %v306_v45  ;;  %v419_v25 = vld [vmem:[#allocation2 + $0x2f0] sm:$0xff]  ;;  %v410_v36 = vld [vmem:[#allocation2 + $0x2a8] sm:$0xff]  ;;  %v405_v39 = vld [vmem:[#allocation2 + $0x280] sm:$0xff] }
  0x2f   : > { %236 = vmatpush.msra.mxu0 %v193_v22  ;;  %351 = vmatpush.msra.mxu3 %v307_v46  ;;  %v406_v40 = vld [vmem:[#allocation2 + $0x288] sm:$0xff]  ;;  %v403_v41 = vld [vmem:[#allocation2 + $0x270] sm:$0xff]  ;;  %v404_v42 = vld [vmem:[#allocation2 + $0x278] sm:$0xff] }
  0x30   : > { %256 = vmatpush.msra.mxu1 %v194_v27  ;;  %332 = vmatpush.msra.mxu2 %v304_v47  ;;  %v417_v27 = vld [vmem:[#allocation2 + $0x2e0] sm:$0xff]  ;;  %v402_v44 = vld [vmem:[#allocation2 + $0x268] sm:$0xff]  ;;  %v399_v45 = vld [vmem:[#allocation2 + $0x250] sm:$0xff] }
  0x31   : > { %237 = vmatpush.msra.mxu0 %v191_v24  ;;  %352 = vmatpush.msra.mxu3 %v305_v48  ;;  %v401_v43 = vld [vmem:[#allocation2 + $0x260] sm:$0xff]  ;;  %v400_v46 = vld [vmem:[#allocation2 + $0x258] sm:$0xff]  ;;  %v398_v48 = vld [vmem:[#allocation2 + $0x248] sm:$0xff] }
  0x32   : > { %257 = vmatpush.msra.mxu1 %v192_v29  ;;  %333 = vmatpush.msra.mxu2 %v302_v49  ;;  %v415_v29 = vld [vmem:[#allocation2 + $0x2d0] sm:$0xff]  ;;  %v397_v47 = vld [vmem:[#allocation2 + $0x240] sm:$0xff] }
  0x33   : > { %238 = vmatpush.msra.mxu0 %v189_v26  ;;  %353 = vmatpush.msra.mxu3 %v303_v50  ;;  %v420_v26 = vld [vmem:[#allocation2 + $0x2f8] sm:$0xff]  ;;  %v185_v49 = vld [vmem:[%s895_s2 + $0x2] sm:$0x3]  ;;  %v395_v50 = vld [vmem:[#allocation2 + $0x230] sm:$0xff] }
  0x34   : > { %258 = vmatpush.msra.mxu1 %v190_v31  ;;  %334 = vmatpush.msra.mxu2 %v300_v51  ;;  %v416_v31 = vld [vmem:[#allocation2 + $0x2d8] sm:$0xff] }
  0x35   : > { %239 = vmatpush.msra.mxu0 %v187_v28  ;;  %354 = vmatpush.msra.mxu3 %v301_v52  ;;  %v418_v28 = vld [vmem:[#allocation2 + $0x2e8] sm:$0xff]  ;;  %v396_v51 = vld [vmem:[#allocation2 + $0x238] sm:$0xff]  ;;  %v321_v52 = vperm.slane %v185_v49, 0 }
  0x36   : > { %240 = vmatmul.f32.vlgmr.msra.gmra.mxu0 %v840_v30  ;;  %259 = vmatpush.msra.mxu1 %v188_v32  ;;  %v413_v32 = vld [vmem:[#allocation2 + $0x2c0] sm:$0xff] }
  0x37   : > { %260 = vmatmul.f32.vlgmr.msra.gmra.mxu1 %v840_v30  ;;  %335 = vmatpush.msra.mxu2 %v298_v53  ;;  %v393_v53 = vld [vmem:[#allocation2 + $0x220] sm:$0xff] }
  0x38   : > { %355 = vmatpush.msra.mxu3 %v299_v54  ;;  %426 = vmatpush.msrb.mxu0 %v419_v25  ;;  %v394_v54 = vld [vmem:[#allocation2 + $0x228] sm:$0xff] }
  0x39   : > { %336 = vmatpush.msra.mxu2 %v296_v55  ;;  %446 = vmatpush.msrb.mxu1 %v420_v26  ;;  %v391_v55 = vld [vmem:[#allocation2 + $0x210] sm:$0xff] }
  0x3a   : > { %356 = vmatpush.msra.mxu3 %v297_v56  ;;  %427 = vmatpush.msrb.mxu0 %v417_v27  ;;  %v392_v56 = vld [vmem:[#allocation2 + $0x218] sm:$0xff] }
  0x3b   : > { %337 = vmatpush.msra.mxu2 %v294_v58  ;;  %447 = vmatpush.msrb.mxu1 %v418_v28 }
  0x3c   : > { %357 = vmatpush.msra.mxu3 %v295_v59  ;;  %428 = vmatpush.msrb.mxu0 %v415_v29  ;;  %v389_v59 = vld [vmem:[#allocation2 + $0x200] sm:$0xff] }
  0x3d   : > { %338 = vmatpush.msra.mxu2 %v292_v61  ;;  %448 = vmatpush.msrb.mxu1 %v416_v31 }
  0x3e   : > { %358 = vmatpush.msra.mxu3 %v293_v62  ;;  %429 = vmatpush.msrb.mxu0 %v413_v32 }
  0x3f   : > { %339 = vmatpush.msra.mxu2 %v290_v63  ;;  %449 = vmatpush.msrb.mxu1 %v414_v33 }
  0x40   : > { %359 = vmatpush.msra.mxu3 %v291_v0  ;;  %v322_v0 = vperm.slane %v185_v49, 1 }
  0x41   : > { %340 = vmatpush.msra.mxu2 %v288_v3  ;;  %450 = vmatpush.msrb.mxu1 %v412_v34 }
  0x42   : > { %360 = vmatpush.msra.mxu3 %v289_v4 }
  0x43   : > { %451 = vmatpush.msrb.mxu1 %v410_v36 }
  0x45   : > { %452 = vmatpush.msrb.mxu1 %v408_v38 }
  0x47   : > { %453 = vmatpush.msrb.mxu1 %v406_v40 }
  0x49   : > { %454 = vmatpush.msrb.mxu1 %v404_v42 }
  0x4b   : > { %455 = vmatpush.msrb.mxu1 %v402_v44 }
  0x4d   : > { %456 = vmatpush.msrb.mxu1 %v400_v46 }
  0x4f   : > { %457 = vmatpush.msrb.mxu1 %v398_v48 }
  0x51   : > { %458 = vmatpush.msrb.mxu1 %v396_v51 }
  0x53   : > { %459 = vmatpush.msrb.mxu1 %v394_v54 }
  0x55   : > { %460 = vmatpush.msrb.mxu1 %v392_v56 }
  0xb3   : > { %v241_v1 = vpop.f32.mrf.mxu0 }
  0xb4   : > { %v242_v2 = vadd.f32 %v241_v1, %v220_v60  ;;  %v261_v9 = vpop.f32.mrf.mxu1  ;;  %v390_v60 = vld [vmem:[#allocation2 + $0x208] sm:$0xff] }
  0xb5   : > { %v262_v10 = vadd.f32 %v261_v9, %v221_v8  ;;  %461 = vmatpush.msrb.mxu1 %v390_v60 }
  0xb6   : > { %v585_v5 = vmul.f32 -1.442695, %v242_v2 }
  0xb7   : > { %v283_v14 = vmax.f32 %v262_v10, 0.0 }
  0xb8   : > { %644 = vpow2.f32 %v585_v5 }
  0xb9   : > { %v284_v19 = vsub.f32 %v283_v14, %v840_v30 }
  0xbe   : > { %v645_v6 = vpop.eup %644 }
  0xbf   : > { %v267_v7 = vadd.f32 1.0, %v645_v6 }
  0xc1   : > { %646 = vrcp.f32 %v267_v7  ;;  %v279_v15 = vand.u32 2147483648, %v267_v7  ;;  %v277_v17 = vand.u32 2147483647, %v267_v7  ;;  %vm273_vm1 = vweird.f32 %v267_v7 }
  0xc3   : > { %v280_v20 = vor.u32 1.1754944e-38, %v279_v15  ;;  %vm278_vm3 = vcmp.eq.f32.partialorder %v277_v17, 8.507059e+37  ;;  %v186_v17 = vld [vmem:[%s895_s2 + $0x4] sm:$0x3] }
  0xc4   : > { %v423_v25 = vperm.slane %v186_v17, 1 }
  0xc7   : > { %v647_v11 = vpop.eup %646 }
  0xc8   : > { %v269_v12 = vmul.f32 %v647_v11, %v267_v7  ;;  %vm274_vm0 = vweird.f32 %v647_v11 }
  0xc9   : > { %vm275_vm2 = vmor %vm273_vm1, %vm274_vm0 }
  0xca   : > { %v270_v13 = vsub.f32 1.0, %v269_v12 }
  0xcc   : > { %v271_v16 = vmul.f32 %v647_v11, %v270_v13 }
  0xce   : > { %v272_v18 = vadd.f32 %v647_v11, %v271_v16 }
  0xd0   : > { %v276_v21 = vsel %vm275_vm2, %v647_v11, %v272_v18  ;;  %v422_v18 = vperm.slane %v186_v17, 0 }
  0xd1   : > { %v281_v22 = vsel %vm278_vm3, %v280_v20, %v276_v21 }
  0xd2   : > { %v285_v23 = vmul.f32 %v284_v19, %v281_v22 }
  0xd4   : > { %v849_v24 = vadd.f32 %v285_v23, %v840_v30  ;;  %v411_v30 = vld [vmem:[#allocation2 + $0x2b0] sm:$0xff] }
  0xd5   : > { %430 = vmatpush.msrb.mxu0 %v411_v30 }
  0xd6   : > { %341 = vmatmul.f32.vlgmr.msra.gmra.mxu2 %v849_v24  ;;  %361 = vmatmul.f32.vlgmr.msra.gmra.mxu3 %v849_v24 }
  0xd7   : > { %431 = vmatpush.msrb.mxu0 %v409_v35 }
  0xd9   : > { %432 = vmatpush.msrb.mxu0 %v407_v37 }
  0xdb   : > { %433 = vmatpush.msrb.mxu0 %v405_v39 }
  0xdd   : > { %434 = vmatpush.msrb.mxu0 %v403_v41 }
  0xdf   : > { %435 = vmatpush.msrb.mxu0 %v401_v43 }
  0xe1   : > { %436 = vmatpush.msrb.mxu0 %v399_v45 }
  0xe3   : > { %437 = vmatpush.msrb.mxu0 %v397_v47 }
  0xe5   : > { %438 = vmatpush.msrb.mxu0 %v395_v50 }
  0xe7   : > { %439 = vmatpush.msrb.mxu0 %v393_v53 }
  0xe9   : > { %440 = vmatpush.msrb.mxu0 %v391_v55 }
  0xeb   : > { %441 = vmatpush.msrb.mxu0 %v389_v59 }
 0x159   : > { %v342_v57 = vpop.f32.mrf.mxu2  ;;  %v362_v1 = vpop.f32.mrf.mxu3 }
 0x15a   : > { %v343_v58 = vadd.f32 %v342_v57, %v321_v52  ;;  %v363_v4 = vadd.f32 %v362_v1, %v322_v0 }
 0x15c   : > { %v586_v61 = vmul.f32 -1.442695, %v343_v58  ;;  %v384_v9 = vmax.f32 %v363_v4, 0.0 }
 0x15e   : > { %648 = vpow2.f32 %v586_v61  ;;  %v385_v13 = vsub.f32 %v384_v9, %v849_v24 }
 0x164   : > { %v649_v62 = vpop.eup %648 }
 0x165   : > { %v368_v63 = vadd.f32 1.0, %v649_v62 }
 0x167   : > { %650 = vrcp.f32 %v368_v63  ;;  %v380_v6 = vand.u32 2147483648, %v368_v63  ;;  %v378_v8 = vand.u32 2147483647, %v368_v63  ;;  %vm374_vm5 = vweird.f32 %v368_v63 }
 0x169   : > { %v381_v11 = vor.u32 1.1754944e-38, %v380_v6  ;;  %vm379_vm7 = vcmp.eq.f32.partialorder %v378_v8, 8.507059e+37 }
 0x16d   : > { %v651_v2 = vpop.eup %650 }
 0x16e   : > { %v370_v3 = vmul.f32 %v651_v2, %v368_v63  ;;  %vm375_vm4 = vweird.f32 %v651_v2 }
 0x16f   : > { %vm376_vm6 = vmor %vm374_vm5, %vm375_vm4 }
 0x170   : > { %v371_v5 = vsub.f32 1.0, %v370_v3 }
 0x172   : > { %v372_v7 = vmul.f32 %v651_v2, %v371_v5 }
 0x174   : > { %v373_v10 = vadd.f32 %v651_v2, %v372_v7 }
 0x176   : > { %v377_v12 = vsel %vm376_vm6, %v651_v2, %v373_v10 }
 0x177   : > { %v382_v14 = vsel %vm379_vm7, %v381_v11, %v377_v12 }
 0x178   : > { %v386_v15 = vmul.f32 %v385_v13, %v382_v14 }
 0x17a   : > { %v387_v16 = vadd.f32 %v386_v15, %v849_v24 }
 0x17c   : > { %442 = vmatmul.f32.vlgmr.msrb.gmra.mxu0 %v387_v16  ;;  %462 = vmatmul.f32.vlgmr.msrb.gmra.mxu1 %v387_v16 }
 0x1f9   : > { %v443_v19 = vpop.f32.mrf.mxu0  ;;  %v463_v26 = vpop.f32.mrf.mxu1 }
 0x1fa   : > { %v444_v20 = vadd.f32 %v443_v19, %v422_v18  ;;  %v464_v28 = vadd.f32 %v463_v26, %v423_v25 }
 0x1fc   : > { %v587_v21 = vmul.f32 -1.442695, %v444_v20  ;;  %v485_v30 = vmax.f32 %v464_v28, 0.0 }
 0x1fe   : > { %652 = vpow2.f32 %v587_v21  ;;  %v486_v37 = vsub.f32 %v485_v30, %v387_v16 }
 0x204   : > { %v653_v22 = vpop.eup %652 }
 0x205   : > { %v469_v23 = vadd.f32 1.0, %v653_v22 }
 0x207   : > { %654 = vrcp.f32 %v469_v23  ;;  %v481_v31 = vand.u32 2147483648, %v469_v23  ;;  %v479_v33 = vand.u32 2147483647, %v469_v23  ;;  %vm475_vm9 = vweird.f32 %v469_v23 }
 0x209   : > { %v482_v35 = vor.u32 1.1754944e-38, %v481_v31  ;;  %vm480_vm11 = vcmp.eq.f32.partialorder %v479_v33, 8.507059e+37 }
 0x20d   : > { %v655_v27 = vpop.eup %654 }
 0x20e   : > { %v471_v24 = vmul.f32 %v655_v27, %v469_v23  ;;  %vm476_vm8 = vweird.f32 %v655_v27 }
 0x20f   : > { %vm477_vm10 = vmor %vm475_vm9, %vm476_vm8 }
 0x210   : > { %v472_v29 = vsub.f32 1.0, %v471_v24 }
 0x212   : > { %v473_v32 = vmul.f32 %v655_v27, %v472_v29 }
 0x214   : > { %v474_v34 = vadd.f32 %v655_v27, %v473_v32 }
 0x216   : > { %v478_v36 = vsel %vm477_vm10, %v655_v27, %v474_v34 }
 0x217   : > { %v483_v38 = vsel %vm480_vm11, %v482_v35, %v478_v36 }
 0x218   : > { %v487_v39 = vmul.f32 %v486_v37, %v483_v38 }
 0x21a   : > { %v488_v40 = vadd.f32 %v487_v39, %v387_v16 }
 0x21c   : > { %489 = vst [vmem:[%s178_s30] sm:$0xff] %v488_v40 }
 0x21d   : > { %713 = shalt.err (!%p710_p8)
}
 0x21e   : > { %596 = dma.vmem_to_hbm [thread:$0]  (%p815_p5), %s504_s4, 128, %s506_s16, %s491_s5  }
 0x21f PF: > { %p608_p9 = scmp.ge.s32.totalorder %s752_s15, 2  ;;  %s517_s19 = sand.u32 1, %s740_s12  }
 0x220   : > { %s518_s20 = scalar_lea.sflag [#allocation4], %s517_s19 }
 0x221   : > { %p603_p10 = pnand %p608_p9, %p819_p6 }
 0x223   : > { %p604_p11 = pneg %p603_p10 }
 0x225   : > { %735 = dma.done.wait (%p604_p11), %s518_s20, 128  }
 0x226   : > { %737 = vsyncadd (%p604_p11), %s518_s20, 4294967168  ;;  %p14_p12 = scmp.ge.s32.totalorder %s802_s18, 4   ;;  %s899_s12 = smov %s744_s13 }
 0x227   : > { %s900_s13 = smov %s748_s14  ;;  %s901_s14 = smov %s813_s21 }
 0x228   : > { %s902_s15 = smov %s802_s18  ;;  %16 = sbr.rel (!%p14_p12) target bundleno = 4 (0x4), region = 74 }
 0x22d   :  { %524 = vsyncpa [#allocation3], 1 }
 0x22e   :  { %526 = vsyncpa [#allocation3 + $0x1], 1 }
 0x22f   :  { %527 = vsyncpa [#allocation4], 1 }
 0x230   :  { %529 = vsyncpa [#allocation4 + $0x1], 1 }

</bundles_post_ra>
